<compile_context>
chip_gen: v7x
topology: tpu7x:2x2x1
jax: 0.10.0
libtpu: 0.0.40
codegen_flags: <defaults>
</compile_context>

<pallas_src>
import functools
import math

import numpy as np
import jax
import jax.numpy as jnp
from jax.experimental import pallas as pl
from jax.experimental.pallas import tpu as pltpu


def _shifted_dft_matrix(n):
    """Complex A with A @ v == fftshift(fft(ifftshift(v))) along axis 0."""
    eye = np.eye(n, dtype=np.float64)
    return np.fft.fftshift(np.fft.fft(np.fft.ifftshift(eye, axes=0), axis=0), axes=0)


def _vmem_capacity_bytes():
    try:
        return int(pltpu.get_tpu_info().vmem_capacity_bytes)
    except Exception:
        return 64 * 1024 * 1024     # conservative: v7x has 64 MiB per TensorCore


def _pick_channel_chunk(C, per_channel_bytes, budget_bytes, sub_align):
    """Channels per block.  Never exceeds the budget; pads C up when chunking."""
    c = min(C, max(1, budget_bytes // max(per_channel_bytes, 1)))
    if c >= C:
        return C, C                                       # one chunk == full dim
    c = max(sub_align, (c // sub_align) * sub_align)      # (8,128) block alignment
    c_pad = ((C + c - 1) // c) * c                        # grid = cdiv(C, c)
    return c, c_pad


# -----------------------------------------------------------------------------
# Kernel A: small images — fused 2-D DFT as one kron matrix, channels on M.
# -----------------------------------------------------------------------------
def _kron_kernel(x_ref, y_ref, krt_ref, kit_ref, o_ref, *, inv_norm):
    cc = pl.program_id(1)

    @pl.when(cc == 0)
    def _init():
        o_ref[...] = jnp.zeros_like(o_ref)

    # FFT is linear -> transform the difference once.  bf16 operands, f32 acc.
    d = x_ref[0] - y_ref[0]                                        # (Cc, H*W) bf16
    fr = jnp.dot(d, krt_ref[...], preferred_element_type=jnp.float32)
    fi = jnp.dot(d, kit_ref[...], preferred_element_type=jnp.float32)
    partial = jnp.sum(jnp.sqrt(fr * fr + fi * fi))
    # Accumulate in the resident, lane-dense (1, 8, 128) output block.
    o_ref[...] = o_ref[...] + partial * inv_norm


# -----------------------------------------------------------------------------
# Kernel B: large images — separable DFT, both passes batched over the chunk.
# -----------------------------------------------------------------------------
def _sep_kernel(x_ref, y_ref, brt_ref, bit_ref, ar_mai_ref, ai_ar_ref, o_ref,
                opk_ref, *, H, W, c_chunk, inv_norm):
    cc = pl.program_id(1)

    @pl.when(cc == 0)
    def _init():
        o_ref[...] = jnp.zeros_like(o_ref)

    d = x_ref[0] - y_ref[0]                                        # (Cc*H, W) bf16

    # W-axis shifted DFT: all channels stacked on M, one matmul per re/im part.
    m1r = jnp.dot(d, brt_ref[...], preferred_element_type=jnp.float32)
    m1i = jnp.dot(d, bit_ref[...], preferred_element_type=jnp.float32)
    m1r = m1r.astype(jnp.bfloat16)          # consumed immediately below
    m1i = m1i.astype(jnp.bfloat16)

    # Corner turn: move channels from the row blocks to the lane axis and stack
    # re/im on K.  Static block copies through VMEM scratch (cheap, robust).
    for c in range(c_chunk):
        opk_ref[0:H, c * W:(c + 1) * W] = m1r[c * H:(c + 1) * H, :]
        opk_ref[H:2 * H, c * W:(c + 1) * W] = m1i[c * H:(c + 1) * H, :]
    opk = opk_ref[...]                                             # (2H, Cc*W) bf16

    # H-axis shifted DFT for the whole chunk in ONE pair of matmuls (K = 2H):
    #   fr = Ar@Mr - Ai@Mi ,  fi = Ai@Mr + Ar@Mi
    fr = jnp.dot(ar_mai_ref[...], opk, preferred_element_type=jnp.float32)
    fi = jnp.dot(ai_ar_ref[...], opk, preferred_element_type=jnp.float32)
    partial = jnp.sum(jnp.sqrt(fr * fr + fi * fi))
    o_ref[...] = o_ref[...] + partial * inv_norm


# -----------------------------------------------------------------------------
# Wrapper
# -----------------------------------------------------------------------------
def fft_loss(x, y, *, kron_max_hw=1024):
    """Pallas TPU implementation of PerceptualLoss(FFTLoss(norm=1, power=1))."""
    x = jnp.asarray(x)
    y = jnp.asarray(y)
    B, H, W = x.shape[0], x.shape[-2], x.shape[-1]
    x = jnp.reshape(x, (B, -1, H, W))
    y = jnp.reshape(y, (B, -1, H, W))
    C = x.shape[1]
    inv_norm = 1.0 / float(C * H * W)

    # bf16 inputs: halves HBM traffic and the double-buffered VMEM footprint.
    xb = x.astype(jnp.bfloat16)
    yb = y.astype(jnp.bfloat16)

    vmem_cap = _vmem_capacity_bytes()
    vmem_limit = max(32 << 20, min((vmem_cap * 3) // 4, 96 << 20))

    a_h = _shifted_dft_matrix(H)
    b_w = _shifted_dft_matrix(W)

    if H * W <= kron_max_hw:
        # ---- fused path: single kron-DFT, channels on M ----------------------
        kron = np.kron(a_h, b_w)                                   # (HW, HW) complex
        krt = jnp.asarray(kron.real.T, jnp.bfloat16)
        kit = jnp.asarray(kron.imag.T, jnp.bfloat16)
        const_bytes = 2 * (H * W) * (H * W) * 2
        budget = max(H * W * 2, (vmem_limit * 4 // 5 - const_bytes) // 10)
        c_chunk, c_pad = _pick_channel_chunk(C, H * W * 2, budget, 8)
        xk = xb.reshape(B, C, H * W)
        yk = yb.reshape(B, C, H * W)
        if c_pad != C:
            pad = ((0, 0), (0, c_pad - C), (0, 0))
            xk, yk = jnp.pad(xk, pad), jnp.pad(yk, pad)
        n_cc = c_pad // c_chunk
        kernel = functools.partial(_kron_kernel, inv_norm=inv_norm)
        in_specs = [
            pl.BlockSpec((1, c_chunk, H * W), lambda b, k: (b, k, 0)),
            pl.BlockSpec((1, c_chunk, H * W), lambda b, k: (b, k, 0)),
            # Constant operands (index map never changes -> DMA'd only once).
            # TODO(synk): pipeline_mode=pl.Buffered(1) would halve their VMEM.
            pl.BlockSpec((H * W, H * W), lambda b, k: (0, 0)),
            pl.BlockSpec((H * W, H * W), lambda b, k: (0, 0)),
        ]
        args = (xk, yk, krt, kit)
        scratch = []
        flops = 4 * B * c_pad * (H * W) ** 2 + 6 * B * c_pad * H * W
        bytes_accessed = (2 * B * C * H * W * 2 + 2 * (H * W) ** 2 * 2
                          + B * 8 * 128 * 4)
    else:
        # ---- separable path: two batched DFT passes per chunk ----------------
        brt = jnp.asarray(b_w.real.T, jnp.bfloat16)                         # (W, W)
        bit = jnp.asarray(b_w.imag.T, jnp.bfloat16)                         # (W, W)
        ar_mai = jnp.asarray(np.concatenate([a_h.real, -a_h.imag], axis=1),
                             jnp.bfloat16)                                  # (H, 2H)
        ai_ar = jnp.asarray(np.concatenate([a_h.imag, a_h.real], axis=1),
                            jnp.bfloat16)                                   # (H, 2H)
        const_bytes = (2 * W * W + 4 * H * H) * 2
        budget = max(H * W * 2, (vmem_limit * 4 // 5 - const_bytes) // 10)
        sub_align = 8 // math.gcd(H, 8)
        c_chunk, c_pad = _pick_channel_chunk(C, H * W * 2, budget, sub_align)
        if c_pad != C:
            pad = ((0, 0), (0, c_pad - C), (0, 0), (0, 0))
            xb, yb = jnp.pad(xb, pad), jnp.pad(yb, pad)
        x2 = xb.reshape(B, c_pad * H, W)
        y2 = yb.reshape(B, c_pad * H, W)
        n_cc = c_pad // c_chunk
        kernel = functools.partial(_sep_kernel, H=H, W=W, c_chunk=c_chunk,
                                   inv_norm=inv_norm)
        in_specs = [
            pl.BlockSpec((1, c_chunk * H, W), lambda b, k: (b, k, 0)),
            pl.BlockSpec((1, c_chunk * H, W), lambda b, k: (b, k, 0)),
            pl.BlockSpec((W, W), lambda b, k: (0, 0)),
            pl.BlockSpec((W, W), lambda b, k: (0, 0)),
            pl.BlockSpec((H, 2 * H), lambda b, k: (0, 0)),
            pl.BlockSpec((H, 2 * H), lambda b, k: (0, 0)),
        ]
        args = (x2, y2, brt, bit, ar_mai, ai_ar)
        scratch = [pltpu.VMEM((2 * H, c_chunk * W), jnp.bfloat16)]
        flops = (4 * B * c_pad * H * W * W + 8 * B * c_pad * H * H * W
                 + 6 * B * c_pad * H * W)
        bytes_accessed = (2 * B * C * H * W * 2 + (2 * W * W + 4 * H * H) * 2
                          + B * 8 * 128 * 4)

    grid_spec = pltpu.PrefetchScalarGridSpec(
        num_scalar_prefetch=0,
        grid=(B, n_cc),
        in_specs=in_specs,
        out_specs=pl.BlockSpec((1, 8, 128), lambda b, k: (b, 0, 0)),
        scratch_shapes=scratch,
    )

    out = pl.pallas_call(
        kernel,
        out_shape=jax.ShapeDtypeStruct((B, 8, 128), jnp.float32),
        grid_spec=grid_spec,
        compiler_params=pltpu.CompilerParams(
            dimension_semantics=("parallel", "arbitrary"),
            vmem_limit_bytes=int(vmem_limit),
        ),
        cost_estimate=pl.CostEstimate(
            flops=int(flops),
            transcendentals=int(B * c_pad * H * W),
            bytes_accessed=int(bytes_accessed),
        ),
    )(*args)

    # Per-batch scalar, matching loss_fn(x, y).view(x.shape[0], -1) -> (B, 1).
    return out[:, 0, :1]


if __name__ == "__main__":
    def reference(x, y):
        xn = np.asarray(x, np.float64)
        yn = np.asarray(y, np.float64)
        B, H, W = xn.shape[0], xn.shape[-2], xn.shape[-1]
        xn = xn.reshape(B, -1, H, W)
        yn = yn.reshape(B, -1, H, W)
        C = xn.shape[1]
        xf = np.fft.fftshift(np.fft.fft2(np.fft.ifftshift(xn, axes=(-1, -2))),
                             axes=(-1, -2))
        yf = np.fft.fftshift(np.fft.fft2(np.fft.ifftshift(yn, axes=(-1, -2))),
                             axes=(-1, -2))
        return (np.abs(xf - yf).sum(axis=(1, 2, 3)) / float(C * H * W)).reshape(B, 1)

    key = jax.random.PRNGKey(0)
    kx, ky = jax.random.split(key)

    # Small-image shape (exercises the fused kron-DFT kernel).
    x = jax.random.normal(kx, (2, 4, 16, 16), jnp.float32)
    y = jax.random.normal(ky, (2, 4, 16, 16), jnp.float32)
    out = jax.block_until_ready(fft_loss(x, y))
    np.testing.assert_allclose(np.asarray(out), reference(x, y), rtol=2e-2, atol=2e-2)

    # Wider layout, forced through the separable two-pass kernel.
    x2 = jax.random.normal(kx, (2, 4, 8, 128), jnp.float32)
    y2 = jax.random.normal(ky, (2, 4, 8, 128), jnp.float32)
    out2 = jax.block_until_ready(fft_loss(x2, y2, kron_max_hw=0))
    np.testing.assert_allclose(np.asarray(out2), reference(x2, y2), rtol=2e-2, atol=2e-2)

    print("KERNEL_OK")
</pallas_src>

<mosaic_0001>
module attributes {stable_mosaic.version = 11 : i64} {
  func.func @_kron_kernel(%arg0: i32, %arg1: i32, %arg2: memref<1x4x256xbf16, #tpu.memory_space<vmem>>, %arg3: memref<1x4x256xbf16, #tpu.memory_space<vmem>>, %arg4: memref<256x256xbf16, #tpu.memory_space<vmem>>, %arg5: memref<256x256xbf16, #tpu.memory_space<vmem>>, %arg6: memref<1x8x128xf32, #tpu.memory_space<vmem>>) attributes {dimension_semantics = [#tpu.dimension_semantics<parallel>, #tpu.dimension_semantics<arbitrary>], iteration_bounds = array<i64: 2, 1>, scalar_prefetch = 0 : i64, scratch_operands = 0 : i64, tpu.core_type = #tpu.core_type<tc>, window_params = [{transform_indices = @transform_0, window_bounds = array<i64: 1, 4, 256>}, {transform_indices = @transform_1, window_bounds = array<i64: 1, 4, 256>}, {pipeline_mode = #tpu.pipeline_mode<synchronous>, transform_indices = @transform_2, window_bounds = array<i64: 256, 256>}, {pipeline_mode = #tpu.pipeline_mode<synchronous>, transform_indices = @transform_3, window_bounds = array<i64: 256, 256>}, {transform_indices = @transform_4, window_bounds = array<i64: 1, 8, 128>}]} {
    %c0_i32 = arith.constant 0 : i32
    %0 = arith.cmpi eq, %arg1, %c0_i32 : i32
    %1 = arith.extui %0 : i1 to i32
    %c0_i32_0 = arith.constant 0 : i32
    %2 = arith.cmpi ne, %1, %c0_i32_0 : i32
    scf.if %2 {
      %cst_19 = arith.constant 0.000000e+00 : f32
      %25 = vector.broadcast %cst_19 : f32 to vector<1x8x128xf32>
      %c0_20 = arith.constant 0 : index
      %c0_21 = arith.constant 0 : index
      %c0_22 = arith.constant 0 : index
      %26 = vector.load %arg6[%c0_20, %c0_21, %c0_22] : memref<1x8x128xf32, #tpu.memory_space<vmem>>, vector<1x8x128xf32>
      tpu.vector_store %arg6[%c0_20, %c0_21, %c0_22], %25 {strides = array<i32>} : memref<1x8x128xf32, #tpu.memory_space<vmem>>, vector<1x8x128xf32>,
    } else {
    }
    %c0 = arith.constant 0 : index
    %c0_1 = arith.constant 0 : index
    %c0_2 = arith.constant 0 : index
    %3 = vector.load %arg2[%c0, %c0_1, %c0_2] : memref<1x4x256xbf16, #tpu.memory_space<vmem>>, vector<1x4x256xbf16>
    %4 = vector.shape_cast %3 : vector<1x4x256xbf16> to vector<4x256xbf16>
    %c0_3 = arith.constant 0 : index
    %c0_4 = arith.constant 0 : index
    %c0_5 = arith.constant 0 : index
    %5 = vector.load %arg3[%c0_3, %c0_4, %c0_5] : memref<1x4x256xbf16, #tpu.memory_space<vmem>>, vector<1x4x256xbf16>
    %6 = vector.shape_cast %5 : vector<1x4x256xbf16> to vector<4x256xbf16>
    %7 = arith.subf %4, %6 : vector<4x256xbf16>
    %c0_6 = arith.constant 0 : index
    %c0_7 = arith.constant 0 : index
    %8 = vector.load %arg4[%c0_6, %c0_7] : memref<256x256xbf16, #tpu.memory_space<vmem>>, vector<256x256xbf16>
    %cst = arith.constant dense<0.000000e+00> : vector<4x256xf32>
    %9 = tpu.matmul %7, %8, %cst {dimension_numbers = #tpu.dot_dimension_numbers<[1], [0], [0], [1], [0, 0, 1, 1], [], []>} : vector<4x256xbf16>, vector<256x256xbf16>, vector<4x256xf32> -> vector<4x256xf32>
    %c0_8 = arith.constant 0 : index
    %c0_9 = arith.constant 0 : index
    %10 = vector.load %arg5[%c0_8, %c0_9] : memref<256x256xbf16, #tpu.memory_space<vmem>>, vector<256x256xbf16>
    %cst_10 = arith.constant dense<0.000000e+00> : vector<4x256xf32>
    %11 = tpu.matmul %7, %10, %cst_10 {dimension_numbers = #tpu.dot_dimension_numbers<[1], [0], [0], [1], [0, 0, 1, 1], [], []>} : vector<4x256xbf16>, vector<256x256xbf16>, vector<4x256xf32> -> vector<4x256xf32>
    %12 = arith.mulf %9, %9 : vector<4x256xf32>
    %13 = arith.mulf %11, %11 : vector<4x256xf32>
    %14 = arith.addf %12, %13 : vector<4x256xf32>
    %15 = math.sqrt %14 : vector<4x256xf32>
    %16 = vector.shape_cast %15 : vector<4x256xf32> to vector<1x4x256xf32>
    %cst_11 = arith.constant dense<0.000000e+00> : vector<1xf32>
    %17 = vector.multi_reduction <add>, %16, %cst_11 [1, 2] : vector<1x4x256xf32> to vector<1xf32>
    %18 = vector.shape_cast %17 : vector<1xf32> to vector<1x1x1xf32>
    %19 = vector.extract %18[0, 0, 0] : f32 from vector<1x1x1xf32>
    %c0_12 = arith.constant 0 : index
    %c0_13 = arith.constant 0 : index
    %c0_14 = arith.constant 0 : index
    %20 = vector.load %arg6[%c0_12, %c0_13, %c0_14] : memref<1x8x128xf32, #tpu.memory_space<vmem>>, vector<1x8x128xf32>
    %cst_15 = arith.constant 9.765625E-4 : f32
    %21 = arith.mulf %19, %cst_15 : f32
    %22 = vector.broadcast %21 : f32 to vector<1x8x128xf32>
    %23 = arith.addf %20, %22 : vector<1x8x128xf32>
    %c0_16 = arith.constant 0 : index
    %c0_17 = arith.constant 0 : index
    %c0_18 = arith.constant 0 : index
    %24 = vector.load %arg6[%c0_16, %c0_17, %c0_18] : memref<1x8x128xf32, #tpu.memory_space<vmem>>, vector<1x8x128xf32>
    tpu.vector_store %arg6[%c0_16, %c0_17, %c0_18], %23 {strides = array<i32>} : memref<1x8x128xf32, #tpu.memory_space<vmem>>, vector<1x8x128xf32>,
    return
  }
  func.func @transform_0(%arg0: i32, %arg1: i32) -> (i32, i32, i32) {
    %c0_i32 = arith.constant 0 : i32
    %c0_i32_0 = arith.constant 0 : i32
    return %arg0, %arg1, %c0_i32 : i32, i32, i32
  }
  func.func @transform_1(%arg0: i32, %arg1: i32) -> (i32, i32, i32) {
    %c0_i32 = arith.constant 0 : i32
    %c0_i32_0 = arith.constant 0 : i32
    return %arg0, %arg1, %c0_i32 : i32, i32, i32
  }
  func.func @transform_2(%arg0: i32, %arg1: i32) -> (i32, i32) {
    %c0_i32 = arith.constant 0 : i32
    %c0_i32_0 = arith.constant 0 : i32
    %c0_i32_1 = arith.constant 0 : i32
    return %c0_i32, %c0_i32_0 : i32, i32
  }
  func.func @transform_3(%arg0: i32, %arg1: i32) -> (i32, i32) {
    %c0_i32 = arith.constant 0 : i32
    %c0_i32_0 = arith.constant 0 : i32
    %c0_i32_1 = arith.constant 0 : i32
    return %c0_i32, %c0_i32_0 : i32, i32
  }
  func.func @transform_4(%arg0: i32, %arg1: i32) -> (i32, i32, i32) {
    %c0_i32 = arith.constant 0 : i32
    %c0_i32_0 = arith.constant 0 : i32
    %c0_i32_1 = arith.constant 0 : i32
    return %arg0, %c0_i32, %c0_i32_0 : i32, i32, i32
  }
}

</mosaic_0001>

<bundles_post_ra>
// kernel: tpu_custom_call.1
= control target key start
LH: loop header
LB: loop body
LE: loop exit
PB: predicated region body
PF: predicated region fallthrough
CT: control target
= control target key end

     0   :  { %s1782_s0 = inlined_call_operand.hbm [shape: bf16[2,4,256], index: 0, kind: input, shape index: {}]   ;;  %s1783_s1 = inlined_call_operand.hbm [shape: bf16[2,4,256], index: 1, kind: input, shape index: {}]   ;;  %s1784_s2 = inlined_call_operand.hbm [shape: bf16[256,256], index: 2, kind: input, shape index: {}]   ;;  %s1785_s3 = inlined_call_operand.hbm [shape: bf16[256,256], index: 3, kind: input, shape index: {}]   ;;  %s1786_s4 = inlined_call_operand.hbm [shape: f32[2,8,128], index: 4, kind: output, shape index: {}]  }
   0x1   :  { %1792 = sst [smem:[#allocation17_spill]] %s1784_s2 }
   0x2   :  { %1793 = sst [smem:[#allocation18_spill]] %s1785_s3 }
   0x3   :  { %9 = vsyncpa [#allocation3], 0 }
   0x4   :  { %11 = vsyncpa [#allocation3 + $0x1], 0 }
   0x5   :  { %12 = vsyncpa [#allocation6], 0 }
   0x6   :  { %14 = vsyncpa [#allocation6 + $0x1], 0 }
   0x7   :  { %15 = vsyncpa [#allocation9], 0 }
   0x8   :  { %16 = vsyncpa [#allocation4], 0 }
   0x9   :  { %18 = vsyncpa [#allocation4 + $0x1], 0  ;;  %s1491_s15 = smov 0   ;;  %s1493_s16 = smov 0  }
   0xa   :  { %s1495_s17 = smov 0   ;;  %s1497_s18 = smov 0  }
   0xb   :  { %s1499_s19 = smov 0   ;;  %s1501_s20 = smov 0  }
   0xc LB: > { %s1522_s21 = sadd.s32 4294967295, %s1456_s20   ;;  %s965_s22 = sadd.s32 4294967294, %s1456_s20   ;;  %s1456_s20 = sphi %s1501_s20, %s24_s20   ;;  %s1452_s19 = sphi %s1499_s19, %s1818_s19   ;;  %s1448_s18 = sphi %s1497_s18, %s1817_s18   ;;  %s1444_s17 = sphi %s1495_s17, %s1816_s17   ;;  %s1440_s16 = sphi %s1493_s16, %s1815_s16   ;;  %s1436_s15 = sphi %s1491_s15, %s1814_s15  }
   0xd   : > { %p58_p0 = scmp.ne.s32.totalorder %s1440_s16, %s1436_s15  ;;  %p1787_p1 = scmp.eq.s32.totalorder %s1522_s21, 0 }
   0xe   : > { %p158_p3 = scmp.eq.s32.totalorder %s965_s22, 1  ;;  %p966_p5 = scmp.ge.s32.totalorder %s1456_s20, 1 }
   0xf   : > { %p1531_p4 = por %p1787_p1, %p58_p0  ;;  %p165_p7 = scmp.lt.s32.totalorder %s1456_s20, 3 }
  0x10   : > { %p1536_p6 = por %p158_p3, %p58_p0  ;;  %s1458_s26 = smov [#allocation7]  }
  0x11   : > { %s1794_s23 = scalar_select %p1531_p4, 1, 0 }
  0x12   : > { %s1795_s24 = scalar_select %p1536_p6, 1, 0 }
  0x13   : > { %p1541_p8 = pnand %p966_p5, %p165_p7  ;;  %s177_s27 = sshll.u32 %s1458_s26, 4  ;;  %s1545_s27 = int_to_ptr.vmem [resolvable:$true] %s177_s27 }
  0x14   : > { %s1459_s29 = smov [#allocation8]   ;;  %s1798_s2 = sld [smem:[#allocation17_spill]] }
  0x15   : > { %s1796_s25 = scalar_select %p1541_p8, 1, 0 }
  0x16   : > { %p1068_p9 = pneg %p1541_p8  ;;  %s190_s30 = sshll.u32 %s1459_s29, 4  ;;  %s1556_s30 = int_to_ptr.vmem [resolvable:$true] %s190_s30 }
  0x18   : > { %p1552_p11 = pnand %p1068_p9, %p1787_p1 }
  0x1a   : > { %s1246_s7 = scalar_lea.hbm %s1798_s2, 4096  ;;  %p1248_p13 = pneg %p1552_p11 }
  0x1b   : > { %p1247_p12 = scmp.ne.s32.totalorder %s1798_s2, %s1246_s7  ;;  %p1253_p5 = scmp.lt.u32.totalorder %s1246_s7, %s1798_s2 }
  0x1d   : > { %p1249_p0 = pnand %p1248_p13, %p1247_p12 }
  0x1f   : > { %p1250_p3 = pneg %p1249_p0 }
  0x21   : > { %p1255_p7 = pnand %p1253_p5, %p1250_p3 }
  0x23   : > { %1258 = shalt.err (!%p1255_p7)
}
  0x24   : > { %s1259_s12 = scalar_lea.vmem %s1545_s27, 4096  ;;  %p1267_p2 = scmp.lt.s32.totalorder %s1545_s27, %s1545_s27 }
  0x25   : > { %p1260_p9 = scmp.ne.s32.totalorder %s1545_s27, %s1259_s12  ;;  %p1268_p12 = scmp.lt.s32.totalorder %s1259_s12, %s1259_s12 }
  0x27   : > { %p1262_p10 = pnand %p1260_p9, %p1248_p13  ;;  %p1269_p0 = por %p1268_p12, %p1267_p2 }
  0x29   : > { %p1263_p1 = pneg %p1262_p10 }
  0x2b   : > { %p1270_p6 = pnand %p1269_p0, %p1263_p1 }
  0x2d   : > { %1273 = shalt.err (!%p1270_p6)
}
  0x2e   : > { %s1460_s13 = smov 128   ;;  %s1461_s14 = smov 8  }
  0x2f   : > { %1071 = dma.hbm_to_vmem [thread:$0]  (!%p1552_p11), %s1798_s2, 4096, %s1545_s27, [#allocation6], %s1460_s13, %s1460_s13, %s1461_s14  }
  0x30   : > { %s1799_s3 = sld [smem:[#allocation18_spill]] }
  0x36   : > { %s1274_s6 = scalar_lea.hbm %s1799_s3, 4096 }
  0x37   : > { %p1275_p2 = scmp.ne.s32.totalorder %s1799_s3, %s1274_s6  ;;  %p1281_p10 = scmp.lt.u32.totalorder %s1274_s6, %s1799_s3 }
  0x39   : > { %p1277_p1 = pnand %p1275_p2, %p1248_p13 }
  0x3b   : > { %p1278_p6 = pneg %p1277_p1 }
  0x3d   : > { %p1283_p3 = pnand %p1281_p10, %p1278_p6 }
  0x3f   : > { %1286 = shalt.err (!%p1283_p3)
}
  0x40   : > { %s1287_s27 = scalar_lea.vmem %s1556_s30, 4096  ;;  %p1295_p12 = scmp.lt.s32.totalorder %s1556_s30, %s1556_s30 }
  0x41   : > { %p1288_p5 = scmp.ne.s32.totalorder %s1556_s30, %s1287_s27  ;;  %p1296_p0 = scmp.lt.s32.totalorder %s1287_s27, %s1287_s27 }
  0x43   : > { %p1290_p7 = pnand %p1288_p5, %p1248_p13  ;;  %p1297_p2 = por %p1296_p0, %p1295_p12 }
  0x45   : > { %p1291_p9 = pneg %p1290_p7 }
  0x47   : > { %p1298_p1 = pnand %p1297_p2, %p1291_p9 }
  0x49   : > { %1301 = shalt.err (!%p1298_p1)
}
  0x4a   : > { %1074 = dma.hbm_to_vmem [thread:$0]  (!%p1552_p11), %s1799_s3, 4096, %s1556_s30, [#allocation9], %s1460_s13, %s1460_s13, %s1461_s14  }
  0x4b   : > { %s36_s22 = sadd.s32 1, %s1452_s19  ;;  %s45_s26 = sadd.s32 1, %s1444_s17 }
  0x4c   : > { %p38_p13 = scmp.ge.s32.totalorder %s36_s22, 2  ;;  %p52_p6 = scmp.ne.s32.totalorder %s1444_s17, %s1440_s16 }
  0x4d   : > { %p53_p10 = scmp.eq.s32.totalorder %s1456_s20, 0  ;;  %p1088_p3 = scmp.lt.s32.totalorder %s1456_s20, 2 }
  0x4e   : > { %s1820_s22 = smov (%p38_p13, %s36_s22), 0  ;;  %p1801_p7 = scmp.eq.s32.totalorder %s1522_s21, 1 }
  0x4f   : > { %1800 = sst [smem:[#allocation16_spill]] %s1820_s22  ;;  %p54_p5 = por %p53_p10, %p52_p6 }
  0x50   : > { %p1620_p9 = por %p1801_p7, %p52_p6  ;;  %s40_s29 = ssub.s32 %s1452_s19, %s1820_s22 }
  0x51   : > { %s204_s5 = sand.u32 1, %s1444_s17   ;;  %p43_p12 = scmp.eq.s32.totalorder %s40_s29, 0 }
  0x52   : > { %s1802_s28 = scalar_select %p1620_p9, 1, 0 }
  0x53   : > { %s1627_s30 = sshll.u32 %s204_s5, 2  ;;  %s1050_s13 = sshll.u32 %s1452_s19, 6 }
  0x54   : > { %s1631_s14 = scalar_select %p43_p12, %s1444_s17, %s45_s26  }
  0x55   : > { %s1636_s8 = scalar_lea.hbm %s1782_s0, %s1050_s13  ;;  %s208_s9 = scalar_lea.vmem [#allocation2], %s1627_s30 }
  0x56   : > { %s218_s10 = sshll.u32 %s208_s9, 4  ;;  %p1641_p11 = pnand %p1088_p3, %p54_p5  ;;  %s1645_s10 = int_to_ptr.vmem [resolvable:$true] %s218_s10 }
  0x57   : > { %s1650_s26 = scalar_lea.hbm %s1783_s1, %s1050_s13  ;;  %s205_s29 = scalar_lea.sflag [#allocation3], %s204_s5 }
  0x58   : > { %s1302_s6 = scalar_lea.hbm %s1636_s8, 64  ;;  %p1304_p2 = pneg %p1641_p11 }
  0x59   : > { %p1303_p0 = scmp.ne.s32.totalorder %s1636_s8, %s1302_s6  ;;  %s1307_s2 = scalar_lea.hbm %s1782_s0, 128 }
  0x5a   : > { %p1308_p6 = scmp.lt.u32.totalorder %s1636_s8, %s1782_s0  ;;  %p1309_p10 = scmp.lt.u32.totalorder %s1307_s2, %s1302_s6 }
  0x5b   : > { %p1305_p1 = pnand %p1304_p2, %p1303_p0  ;;  %p1311_p5 = scmp.lt.u32.totalorder %s1302_s6, %s1636_s8 }
  0x5c   : > { %p1310_p3 = por %p1309_p10, %p1308_p6 }
  0x5d   : > { %p1306_p13 = pneg %p1305_p1 }
  0x5e   : > { %p1312_p7 = por %p1311_p5, %p1310_p3 }
  0x60   : > { %p1313_p12 = pnand %p1312_p7, %p1306_p13 }
  0x62   : > { %1316 = shalt.err (!%p1313_p12)
}
  0x63   : > { %s1317_s5 = scalar_lea.vmem %s1645_s10, 64  ;;  %s1462_s13 = smov [#allocation2]  }
  0x64   : > { %p1318_p0 = scmp.ne.s32.totalorder %s1645_s10, %s1317_s5  ;;  %s1322_s11 = sshll.u32 %s1462_s13, 4  ;;  %s1323_s11 = int_to_ptr.vmem [resolvable:$false] %s1322_s11 }
  0x65   : > { %s1324_s3 = scalar_lea.vmem %s1323_s11, 128  ;;  %p1325_p4 = scmp.lt.s32.totalorder %s1645_s10, %s1323_s11 }
  0x66   : > { %p1320_p1 = pnand %p1318_p0, %p1304_p2  ;;  %p1326_p6 = scmp.lt.s32.totalorder %s1324_s3, %s1317_s5 }
  0x68   : > { %p1321_p9 = pneg %p1320_p1  ;;  %p1327_p10 = por %p1326_p6, %p1325_p4 }
  0x6a   : > { %p1328_p3 = pnand %p1327_p10, %p1321_p9 }
  0x6c   : > { %1331 = shalt.err (!%p1328_p3)
}
  0x6d   : > { %1078 = dma.hbm_to_vmem [thread:$0]  (!%p1641_p11), %s1636_s8, 64, %s1645_s10, %s205_s29  }
  0x6e   : > { %s225_s2 = sand.u32 1, %s1456_s20   ;;  %s229_s22 = scalar_lea.vmem [#allocation5], %s1627_s30 }
  0x6f   : > { %s239_s12 = sshll.u32 %s229_s22, 4  ;;  %s226_s6 = scalar_lea.sflag [#allocation6], %s225_s2  ;;  %s240_s12 = int_to_ptr.vmem [resolvable:$true] %s239_s12 }
  0x70   : > { %s1332_s7 = scalar_lea.hbm %s1650_s26, 64  ;;  %s1337_s13 = scalar_lea.hbm %s1783_s1, 128 }
  0x71   : > { %p1333_p4 = scmp.ne.s32.totalorder %s1650_s26, %s1332_s7  ;;  %p1338_p5 = scmp.lt.u32.totalorder %s1650_s26, %s1783_s1 }
  0x72   : > { %p1339_p7 = scmp.lt.u32.totalorder %s1337_s13, %s1332_s7  ;;  %p1341_p0 = scmp.lt.u32.totalorder %s1332_s7, %s1650_s26 }
  0x73   : > { %p1335_p9 = pnand %p1333_p4, %p1304_p2 }
  0x74   : > { %p1340_p12 = por %p1339_p7, %p1338_p5 }
  0x75   : > { %p1336_p13 = pneg %p1335_p9 }
  0x76   : > { %p1342_p1 = por %p1341_p0, %p1340_p12 }
  0x78   : > { %p1343_p6 = pnand %p1342_p1, %p1336_p13 }
  0x7a   : > { %1346 = shalt.err (!%p1343_p6)
}
  0x7b   : > { %s1347_s30 = scalar_lea.vmem %s240_s12, 64  ;;  %s1463_s8 = smov [#allocation5]  }
  0x7c   : > { %p1348_p10 = scmp.ne.s32.totalorder %s240_s12, %s1347_s30  ;;  %s1352_s10 = sshll.u32 %s1463_s8, 4  ;;  %s1353_s10 = int_to_ptr.vmem [resolvable:$false] %s1352_s10 }
  0x7d   : > { %s1354_s29 = scalar_lea.vmem %s1353_s10, 128  ;;  %p1355_p9 = scmp.lt.s32.totalorder %s240_s12, %s1353_s10 }
  0x7e   : > { %p1350_p3 = pnand %p1348_p10, %p1304_p2  ;;  %p1356_p8 = scmp.lt.s32.totalorder %s1354_s29, %s1347_s30 }
  0x80   : > { %p1351_p4 = pneg %p1350_p3  ;;  %p1357_p5 = por %p1356_p8, %p1355_p9 }
  0x82   : > { %p1358_p7 = pnand %p1357_p5, %p1351_p4 }
  0x84   : > { %1361 = shalt.err (!%p1358_p7)
}
  0x85   : > { %1081 = dma.hbm_to_vmem [thread:$0]  (!%p1641_p11), %s1650_s26, 64, %s240_s12, %s226_s6  }
  0x86   : > { %p1804_p13 = scmp.ne.s32.totalorder %s1796_s25, 0 }
  0x87   : > { %s1701_s2 = sand.u32 (!%p1804_p13), 1, %s1440_s16   ;;  %p1805_p8 = scmp.ne.s32.totalorder (!%p1804_p13), %s1794_s23, 0 }
  0x88   : > { %248 = sbr.rel (%p1804_p13) target bundleno = 676 (0x2a4), region = 36  ;;  %s977_s22 = sshll.u32 (!%p1804_p13), %s1701_s2, 2 }
  0x89   : > { %s251_s7 = scalar_lea.sflag (!%p1804_p13), [#allocation3], %s1701_s2  ;;  %s1705_s9 = scalar_lea.vmem (!%p1804_p13), [#allocation2], %s977_s22 }
  0x8f   : > { %1415 = dma.done.wait (%p1805_p8), %s251_s7, 64  }
  0x90   : > { %1417 = vsyncadd (%p1805_p8), %s251_s7, 4294967232  ;;  %s259_s27 = sand.u32 1, %s1522_s21   ;;  %s1712_s26 = scalar_lea.vmem [#allocation5], %s977_s22 }
  0x91   : > { %s260_s25 = scalar_lea.sflag [#allocation6], %s259_s27 }
  0x92   : > { %1419 = dma.done.wait (%p1805_p8), %s260_s25, 64  }
  0x93   : > { %1421 = vsyncadd (%p1805_p8), %s260_s25, 4294967232  ;;  %p1806_p11 = scmp.eq.s32.totalorder %s1522_s21, 0 }
  0x95   : > { %1423 = dma.done.wait (%p1806_p11), [#allocation6], 4096   ;;  %p1807_p2 = pmov %p1806_p11 }
  0x97   : > { %1425 = vsyncadd (%p1807_p2), [#allocation6], 4294963200  ;;  %p1808_p12 = pmov %p1807_p2 }
  0x98   : > { %p1809_p0 = pmov %p1807_p2 }
  0x99   : > { %1427 = dma.done.wait (%p1808_p12), [#allocation9], 4096  }
  0x9a   : > { %1429 = vsyncadd (%p1809_p0), [#allocation9], 4294963200  ;;  %v1146_v0 = vld [vmem:[#allocation7 + $0x4] ss:$8 sps:$4 sm:$0xff]   ;;  %v1150_v2 = vld [vmem:[#allocation7] ss:$8 sps:$4 sm:$0xff]   ;;  %v345_v40 = vlaneseq }
  0x9b   : > { %v1148_v1 = vld [vmem:[#allocation8 + $0x4] ss:$8 sps:$4 sm:$0xff]   ;;  %512 = vmatprep.subr.bf16.mxu0 %v1146_v0  ;;  %v1151_v3 = vld [vmem:[#allocation8] ss:$8 sps:$4 sm:$0xff]   ;;  %v1152_v4 = vld [vmem:[#allocation7 + $0x14] ss:$8 sps:$4 sm:$0xff]  }
  0x9c   : > { %745 = vmatprep.subr.bf16.mxu1 %v1148_v1  ;;  %513 = vmatpush1.bf16.msra.mxu0 %v1150_v2  ;;  %v1154_v5 = vld [vmem:[#allocation8 + $0x14] ss:$8 sps:$4 sm:$0xff]   ;;  %v1156_v6 = vld [vmem:[#allocation7 + $0x10] ss:$8 sps:$4 sm:$0xff]   ;;  %v1158_v8 = vld [vmem:[#allocation7 + $0x24] ss:$8 sps:$4 sm:$0xff]  }
  0x9d   : > { %746 = vmatpush1.bf16.msra.mxu1 %v1151_v3  ;;  %514 = vmatprep.subr.bf16.mxu0 %v1152_v4  ;;  %v1157_v7 = vld [vmem:[#allocation8 + $0x10] ss:$8 sps:$4 sm:$0xff]   ;;  %v1160_v9 = vld [vmem:[#allocation8 + $0x24] ss:$8 sps:$4 sm:$0xff]   ;;  %v1162_v10 = vld [vmem:[#allocation7 + $0x20] ss:$8 sps:$4 sm:$0xff]  }
  0x9e   : > { %747 = vmatprep.subr.bf16.mxu1 %v1154_v5  ;;  %v1163_v11 = vld [vmem:[#allocation8 + $0x20] ss:$8 sps:$4 sm:$0xff]   ;;  %v1164_v12 = vld [vmem:[#allocation7 + $0x34] ss:$8 sps:$4 sm:$0xff]   ;;  %v1168_v14 = vld [vmem:[#allocation7 + $0x30] ss:$8 sps:$4 sm:$0xff]  }
  0x9f   : > { %v1166_v13 = vld [vmem:[#allocation8 + $0x34] ss:$8 sps:$4 sm:$0xff]   ;;  %v1169_v15 = vld [vmem:[#allocation8 + $0x30] ss:$8 sps:$4 sm:$0xff]   ;;  %v1170_v16 = vld [vmem:[#allocation7 + $0x44] ss:$8 sps:$4 sm:$0xff]  }
  0xa0   : > { %515 = vmatpush1.bf16.msra.mxu0 %v1156_v6  ;;  %v1172_v17 = vld [vmem:[#allocation8 + $0x44] ss:$8 sps:$4 sm:$0xff]   ;;  %v1174_v18 = vld [vmem:[#allocation7 + $0x40] ss:$8 sps:$4 sm:$0xff]   ;;  %v1176_v20 = vld [vmem:[#allocation7 + $0x54] ss:$8 sps:$4 sm:$0xff]  }
  0xa1   : > { %748 = vmatpush1.bf16.msra.mxu1 %v1157_v7  ;;  %516 = vmatprep.subr.bf16.mxu0 %v1158_v8  ;;  %v1175_v19 = vld [vmem:[#allocation8 + $0x40] ss:$8 sps:$4 sm:$0xff]   ;;  %v1178_v21 = vld [vmem:[#allocation8 + $0x54] ss:$8 sps:$4 sm:$0xff]   ;;  %v1180_v22 = vld [vmem:[#allocation7 + $0x50] ss:$8 sps:$4 sm:$0xff]  }
  0xa2   : > { %749 = vmatprep.subr.bf16.mxu1 %v1160_v9  ;;  %v1181_v23 = vld [vmem:[#allocation8 + $0x50] ss:$8 sps:$4 sm:$0xff]   ;;  %v1182_v24 = vld [vmem:[#allocation7 + $0x64] ss:$8 sps:$4 sm:$0xff]   ;;  %v1186_v26 = vld [vmem:[#allocation7 + $0x60] ss:$8 sps:$4 sm:$0xff]  }
  0xa3   : > { %v1184_v25 = vld [vmem:[#allocation8 + $0x64] ss:$8 sps:$4 sm:$0xff]   ;;  %v1187_v27 = vld [vmem:[#allocation8 + $0x60] ss:$8 sps:$4 sm:$0xff]   ;;  %v1188_v28 = vld [vmem:[#allocation7 + $0x74] ss:$8 sps:$4 sm:$0xff]  }
  0xa4   : > { %517 = vmatpush1.bf16.msra.mxu0 %v1162_v10  ;;  %v1190_v29 = vld [vmem:[#allocation8 + $0x74] ss:$8 sps:$4 sm:$0xff]   ;;  %v1192_v30 = vld [vmem:[#allocation7 + $0x70] ss:$8 sps:$4 sm:$0xff]   ;;  %v1194_v32 = vld [vmem:[#allocation7 + $0x84] ss:$8 sps:$4 sm:$0xff]  }
  0xa5   : > { %750 = vmatpush1.bf16.msra.mxu1 %v1163_v11  ;;  %518 = vmatprep.subr.bf16.mxu0 %v1164_v12  ;;  %v1193_v31 = vld [vmem:[#allocation8 + $0x70] ss:$8 sps:$4 sm:$0xff]   ;;  %v1196_v33 = vld [vmem:[#allocation8 + $0x84] ss:$8 sps:$4 sm:$0xff]   ;;  %v1198_v34 = vld [vmem:[#allocation7 + $0x80] ss:$8 sps:$4 sm:$0xff]  }
  0xa6   : > { %751 = vmatprep.subr.bf16.mxu1 %v1166_v13  ;;  %v1199_v35 = vld [vmem:[#allocation8 + $0x80] ss:$8 sps:$4 sm:$0xff]   ;;  %v1200_v36 = vld [vmem:[#allocation7 + $0x94] ss:$8 sps:$4 sm:$0xff]   ;;  %v1464_v38 = vmov 1983009808  }
  0xa7   : > { %v1202_v37 = vld [vmem:[#allocation8 + $0x94] ss:$8 sps:$4 sm:$0xff]   ;;  %v343_v39 = vunpack.c.l.s4 %v1464_v38  ;;  %v1204_v41 = vld [vmem:[#allocation7 + $0x90] ss:$8 sps:$4 sm:$0xff]   ;;  %v1206_v43 = vld [vmem:[#allocation7 + $0xa4] ss:$8 sps:$4 sm:$0xff]  }
  0xa8   : > { %519 = vmatpush1.bf16.msra.mxu0 %v1168_v14  ;;  %v1205_v42 = vld [vmem:[#allocation8 + $0x90] ss:$8 sps:$4 sm:$0xff]   ;;  %v1208_v44 = vld [vmem:[#allocation8 + $0xa4] ss:$8 sps:$4 sm:$0xff]   ;;  %v346_v46 = vshrl.u32 %v345_v40, 7  ;;  %vm806_vm1 = vcmask 1043456  }
  0xa9   : > { %752 = vmatpush1.bf16.msra.mxu1 %v1169_v15  ;;  %520 = vmatprep.subr.bf16.mxu0 %v1170_v16  ;;  %v344_v45 = vunpack.c.0.s8 %v343_v39  ;;  %v1210_v47 = vld [vmem:[#allocation7 + $0xa0] ss:$8 sps:$4 sm:$0xff]   ;;  %v1212_v49 = vld [vmem:[#allocation7 + $0xb4] ss:$8 sps:$4 sm:$0xff]   ;;  %v1216_v54 = vld [vmem:[#allocation7 + $0xb0] ss:$8 sps:$4 sm:$0xff]  }
  0xaa   : > { %753 = vmatprep.subr.bf16.mxu1 %v1172_v17  ;;  %v1211_v48 = vld [vmem:[#allocation8 + $0xa0] ss:$8 sps:$4 sm:$0xff]   ;;  %v1214_v50 = vld [vmem:[#allocation8 + $0xb4] ss:$8 sps:$4 sm:$0xff]   ;;  %v1217_v55 = vld [vmem:[#allocation8 + $0xb0] ss:$8 sps:$4 sm:$0xff]  }
  0xab   : > { %v306_v51 = vld [vmem:[%s1705_s9] sm:$0xf]  ;;  %v347_v52 = vsub.s32 %v344_v45, %v346_v46  ;;  %v307_v53 = vld [vmem:[%s1712_s26] sm:$0xf]  ;;  %v1218_v57 = vld [vmem:[#allocation7 + $0xc4] ss:$8 sps:$4 sm:$0xff]  }
  0xac   : > { %521 = vmatpush1.bf16.msra.mxu0 %v1174_v18  ;;  %v308_v56 = vsub.bf16 %v306_v51, %v307_v53  ;;  %v1220_v58 = vld [vmem:[#allocation8 + $0xc4] ss:$8 sps:$4 sm:$0xff]   ;;  %v1222_v60 = vld [vmem:[#allocation7 + $0xc0] ss:$8 sps:$4 sm:$0xff]   ;;  %v1224_v63 = vld [vmem:[#allocation7 + $0xd4] ss:$8 sps:$4 sm:$0xff]  }
  0xad   : > { %754 = vmatpush1.bf16.msra.mxu1 %v1175_v19  ;;  %522 = vmatprep.subr.bf16.mxu0 %v1176_v20  ;;  %v1223_v61 = vld [vmem:[#allocation8 + $0xc0] ss:$8 sps:$4 sm:$0xff]   ;;  %v1226_v0 = vld [vmem:[#allocation8 + $0xd4] ss:$8 sps:$4 sm:$0xff]   ;;  %v1228_v1 = vld [vmem:[#allocation7 + $0xd0] ss:$8 sps:$4 sm:$0xff]  }
  0xae   : > { %755 = vmatprep.subr.bf16.mxu1 %v1178_v21  ;;  %v348_v59 = vrot.slane %v308_v56, %v347_v52  ;;  %v1229_v2 = vld [vmem:[#allocation8 + $0xd0] ss:$8 sps:$4 sm:$0xff]   ;;  %v1230_v3 = vld [vmem:[#allocation7 + $0xe4] ss:$8 sps:$4 sm:$0xff]   ;;  %v1234_v5 = vld [vmem:[#allocation7 + $0xe0] ss:$8 sps:$4 sm:$0xff]  }
  0xaf   : > { %v1232_v4 = vld [vmem:[#allocation8 + $0xe4] ss:$8 sps:$4 sm:$0xff]   ;;  %v1235_v6 = vld [vmem:[#allocation8 + $0xe0] ss:$8 sps:$4 sm:$0xff]   ;;  %v1236_v7 = vld [vmem:[#allocation7 + $0xf4] ss:$8 sps:$4 sm:$0xff]  }
  0xb0   : > { %523 = vmatpush1.bf16.msra.mxu0 %v1180_v22  ;;  %v349_v62 = vcombine.high %v348_v59, %v348_v59  ;;  %v1238_v8 = vld [vmem:[#allocation8 + $0xf4] ss:$8 sps:$4 sm:$0xff]   ;;  %v1240_v9 = vld [vmem:[#allocation7 + $0xf0] ss:$8 sps:$4 sm:$0xff]   ;;  %s981_s21 = sshll.u32 %s1701_s2, 3  ;;  %s1047_s12 = sshll.u32 %s1448_s18, 7 }
  0xb1   : > { %756 = vmatpush1.bf16.msra.mxu1 %v1181_v23  ;;  %524 = vmatprep.subr.bf16.mxu0 %v1182_v24  ;;  %v1241_v10 = vld [vmem:[#allocation8 + $0xf0] ss:$8 sps:$4 sm:$0xff]   ;;  %s300_s5 = scalar_lea.vmem [#allocation10], %s981_s21  ;;  %s1733_s30 = scalar_lea.hbm %s1786_s4, %s1047_s12 }
  0xb2   : > { %757 = vmatprep.subr.bf16.mxu1 %v1184_v25  ;;  %544 = vmatprep.mubr.bf16.mxu0 %v349_v62  ;;  %s838_s13 = sshll.u32 %s300_s5, 4  ;;  %s825_s8 = scalar_lea.sflag [#allocation4], %s1701_s2  ;;  %s1735_s13 = int_to_ptr.vmem [resolvable:$true] %s838_s13 }
  0xb3   : > { %777 = vmatprep.mubr.bf16.mxu1 %v349_v62  ;;  %s1362_s10 = scalar_lea.vmem %s1735_s13, 128  ;;  %p1810_p6 = scmp.ne.s32.totalorder %s1802_s28, 0 }
  0xb4   : > { %525 = vmatpush1.bf16.msra.mxu0 %v1186_v26  ;;  %p1363_p1 = scmp.ne.s32.totalorder %s1735_s13, %s1362_s10  ;;  %s1465_s18 = smov [#allocation10]  }
  0xb5   : > { %758 = vmatpush1.bf16.msra.mxu1 %v1187_v27  ;;  %526 = vmatprep.subr.bf16.mxu0 %v1188_v28  ;;  %s1366_s29 = sshll.u32 %s1465_s18, 4  ;;  %s1367_s29 = int_to_ptr.vmem [resolvable:$false] %s1366_s29 }
  0xb6   : > { %759 = vmatprep.subr.bf16.mxu1 %v1190_v29  ;;  %p1364_p10 = pnand %p1363_p1, %p1810_p6  ;;  %s1368_s22 = scalar_lea.vmem %s1367_s29, 256 }
  0xb7   : > { %p1369_p4 = scmp.lt.s32.totalorder %s1735_s13, %s1367_s29  ;;  %p1370_p9 = scmp.lt.s32.totalorder %s1368_s22, %s1362_s10 }
  0xb8   : > { %527 = vmatpush1.bf16.msra.mxu0 %v1192_v30  ;;  %p1365_p3 = pneg %p1364_p10 }
  0xb9   : > { %760 = vmatpush1.bf16.msra.mxu1 %v1193_v31  ;;  %528 = vmatprep.subr.bf16.mxu0 %v1194_v32  ;;  %p1371_p5 = por %p1370_p9, %p1369_p4 }
  0xba   : > { %761 = vmatprep.subr.bf16.mxu1 %v1196_v33 }
  0xbb   : > { %p1372_p7 = pnand %p1371_p5, %p1365_p3 }
  0xbc   : > { %529 = vmatpush1.bf16.msra.mxu0 %v1198_v34 }
  0xbd   : > { %762 = vmatpush1.bf16.msra.mxu1 %v1199_v35  ;;  %530 = vmatprep.subr.bf16.mxu0 %v1200_v36 }
  0xbe   : > { %763 = vmatprep.subr.bf16.mxu1 %v1202_v37 }
  0xc0   : > { %531 = vmatpush1.bf16.msra.mxu0 %v1204_v41 }
  0xc1   : > { %764 = vmatpush1.bf16.msra.mxu1 %v1205_v42  ;;  %532 = vmatprep.subr.bf16.mxu0 %v1206_v43 }
  0xc2   : > { %765 = vmatprep.subr.bf16.mxu1 %v1208_v44 }
  0xc4   : > { %533 = vmatpush1.bf16.msra.mxu0 %v1210_v47 }
  0xc5   : > { %766 = vmatpush1.bf16.msra.mxu1 %v1211_v48  ;;  %534 = vmatprep.subr.bf16.mxu0 %v1212_v49 }
  0xc6   : > { %767 = vmatprep.subr.bf16.mxu1 %v1214_v50 }
  0xc8   : > { %535 = vmatpush1.bf16.msra.mxu0 %v1216_v54 }
  0xc9   : > { %768 = vmatpush1.bf16.msra.mxu1 %v1217_v55  ;;  %536 = vmatprep.subr.bf16.mxu0 %v1218_v57 }
  0xca   : > { %769 = vmatprep.subr.bf16.mxu1 %v1220_v58 }
  0xcc   : > { %537 = vmatpush1.bf16.msra.mxu0 %v1222_v60 }
  0xcd   : > { %770 = vmatpush1.bf16.msra.mxu1 %v1223_v61  ;;  %538 = vmatprep.subr.bf16.mxu0 %v1224_v63 }
  0xce   : > { %771 = vmatprep.subr.bf16.mxu1 %v1226_v0 }
  0xd0   : > { %539 = vmatpush1.bf16.msra.mxu0 %v1228_v1 }
  0xd1   : > { %772 = vmatpush1.bf16.msra.mxu1 %v1229_v2  ;;  %540 = vmatprep.subr.bf16.mxu0 %v1230_v3 }
  0xd2   : > { %773 = vmatprep.subr.bf16.mxu1 %v1232_v4 }
  0xd4   : > { %541 = vmatpush1.bf16.msra.mxu0 %v1234_v5 }
  0xd5   : > { %774 = vmatpush1.bf16.msra.mxu1 %v1235_v6  ;;  %542 = vmatprep.subr.bf16.mxu0 %v1236_v7 }
  0xd6   : > { %775 = vmatprep.subr.bf16.mxu1 %v1238_v8 }
  0xd8   : > { %543 = vmatpush1.bf16.msra.mxu0 %v1240_v9 }
  0xd9   : > { %776 = vmatpush1.bf16.msra.mxu1 %v1241_v10 }
  0xdb   : > { %545 = vmatmul.mubr.bf16.vlgmr.msra.gmra.mrb[0].mxu0 %v348_v59 }
  0xdc   : > { %778 = vmatmul.mubr.bf16.vlgmr.msra.gmra.mrb[0].mxu1 %v348_v59 }
 0x1ae   : > { %v546_v11 = vpop.f32.mrb[0].mxu0 }
 0x1af   : > { %v779_v12 = vpop.f32.mrb[0].mxu1  ;;  %v786_v13 = vmul.f32 %v546_v11, %v546_v11  ;;  %v548_v15 = vpop.f32.mrb[1].mxu0 }
 0x1b0   : > { %v788_v14 = vmul.f32 %v779_v12, %v779_v12  ;;  %v781_v16 = vpop.f32.mrb[1].mxu1  ;;  %v787_v17 = vmul.f32 %v548_v15, %v548_v15  ;;  %v550_v19 = vpop.f32.mrb[2].mxu0 }
 0x1b1   : > { %v789_v18 = vmul.f32 %v781_v16, %v781_v16  ;;  %v783_v20 = vpop.f32.mrb[2].mxu1  ;;  %v551_v22 = vpop.f32.mrb[3].mxu0 }
 0x1b2   : > { %v790_v21 = vadd.f32 %v788_v14, %v786_v13  ;;  %v784_v23 = vpop.f32.mrb[3].mxu1 }
 0x1b3   : > { %v791_v24 = vadd.f32 %v789_v18, %v787_v17 }
 0x1b4   : > { %1242 = vrsqrt.f32 %v790_v21  ;;  %vm794_vm0 = vcmp.eq.f32.partialorder %v790_v21, inf  ;;  %v797_v28 = vand.u32 2147483648, %v790_v21  ;;  %vm796_vm2 = vcmp.eq.f32.partialorder %v790_v21, 0.0 }
 0x1b5   : > { %1244 = vrsqrt.f32 %v791_v24  ;;  %vm801_vm3 = vcmp.eq.f32.partialorder %v791_v24, inf  ;;  %v804_v31 = vand.u32 2147483648, %v791_v24  ;;  %vm803_vm4 = vcmp.eq.f32.partialorder %v791_v24, 0.0 }
 0x1be   : > { %v1243_v25 = vpop.eup %1242 }
 0x1bf   : > { %v1245_v26 = vpop.eup %1244  ;;  %v793_v27 = vmul.f32 %v1243_v25, %v790_v21 }
 0x1c0   : > { %v800_v29 = vmul.f32 %v1245_v26, %v791_v24 }
 0x1c1   : > { %v795_v30 = vsel %vm794_vm0, %v790_v21, %v793_v27 }
 0x1c2   : > { %v798_v32 = vsel %vm796_vm2, %v797_v28, %v795_v30  ;;  %v802_v33 = vsel %vm801_vm3, %v791_v24, %v800_v29 }
 0x1c3   : > { %v805_v34 = vsel %vm803_vm4, %v804_v31, %v802_v33  ;;  %v807_v35 = vsel %vm806_vm1, %v798_v32, 0.0 }
 0x1c4   : > { %v808_v36 = vsel %vm806_vm1, %v805_v34, 0.0 }
 0x1c5   : > { %v809_v37 = vadd.f32 %v808_v36, %v807_v35 }
 0x1c7   : > { %810 = vadd.xlane.f32.xlu0 %v809_v37 }
 0x254   : > { %v811_v38 = vpop.xlane.xlu0 %810 }
 0x255   : > { %v812_v39 = vrot.slane %v811_v38, 4 }
 0x257   : > { %v813_v40 = vadd.f32 %v812_v39, %v811_v38 }
 0x259   : > { %v814_v41 = vrot.slane %v813_v40, 2 }
 0x25b   : > { %v815_v42 = vadd.f32 %v814_v41, %v813_v40 }
 0x25d   : > { %v816_v43 = vrot.slane %v815_v42, 1 }
 0x25f   : > { %v817_v44 = vadd.f32 %v816_v43, %v815_v42 }
 0x261   : > { %1052 = vpush %v817_v44 }
 0x292   : > { %s1053_s23 = spop %1052 }
 0x293   : > { %s820_s6 = smul.f32 0.0009765625, %s1053_s23 }
 0x295   : > { %v821_v45 = vstv %s820_s6 }
 0x296   : > { %823 = vst [vmem:[%s300_s5] sm:$0xff] %v821_v45 }
 0x297   : > { %1375 = shalt.err (!%p1372_p7)
}
 0x298   : > { %s1376_s2 = scalar_lea.hbm %s1733_s30, 128  ;;  %s1380_s27 = scalar_lea.hbm %s1786_s4, 256 }
 0x299   : > { %p1377_p13 = scmp.ne.s32.totalorder %s1733_s30, %s1376_s2  ;;  %p1381_p2 = scmp.lt.u32.totalorder %s1733_s30, %s1786_s4 }
 0x29a   : > { %p1382_p12 = scmp.lt.u32.totalorder %s1380_s27, %s1376_s2  ;;  %p1384_p1 = scmp.lt.u32.totalorder %s1376_s2, %s1733_s30 }
 0x29b   : > { %p1378_p8 = pnand %p1377_p13, %p1810_p6 }
 0x29c   : > { %p1383_p0 = por %p1382_p12, %p1381_p2 }
 0x29d   : > { %p1379_p11 = pneg %p1378_p8 }
 0x29e   : > { %p1385_p10 = por %p1384_p1, %p1383_p0 }
 0x2a0   : > { %p1386_p3 = pnand %p1385_p10, %p1379_p11 }
 0x2a2   : > { %1389 = shalt.err (!%p1386_p3)
}
 0x2a3   : > { %1066 = dma.vmem_to_hbm [thread:$0]  (%p1810_p6), %s1735_s13, 128, %s1733_s30, %s825_s8  }
 0x2a4 PF: > { %s850_s21 = sand.u32 1, %s1436_s15   ;;  %p1811_p4 = scmp.ne.s32.totalorder %s1795_s24, 0 }
 0x2a5   : > { %p1812_p9 = scmp.ge.s32.totalorder %s1456_s20, 2  ;;  %s851_s23 = scalar_lea.sflag [#allocation4], %s850_s21 }
 0x2a7   : > { %p1083_p5 = pnand %p1812_p9, %p1811_p4 }
 0x2a9   : > { %1431 = dma.done.wait (!%p1083_p5), %s851_s23, 128  }
 0x2aa   : > { %1433 = vsyncadd (!%p1083_p5), %s851_s23, 4294967168  ;;  %s24_s20 = sadd.s32 1, %s1456_s20   ;;  %s1813_s28 = sld [smem:[#allocation16_spill]] }
 0x2ab   : > { %p21_p7 = scmp.ge.s32.totalorder %s24_s20, 4   ;;  %s1814_s15 = smov %s1440_s16 }
 0x2ac   : > { %s1815_s16 = smov %s1444_s17  ;;  %s1816_s17 = smov %s1631_s14 }
 0x2ad   : > { %s1817_s18 = smov %s1452_s19  ;;  %23 = sbr.rel (!%p21_p7) target bundleno = 12 (0xc), region = 106 }
 0x2b0   : > { %s1818_s19 = smov %s1813_s28 }
 0x2b4   :  { %856 = vsyncpa [#allocation3], 1 }
 0x2b5   :  { %858 = vsyncpa [#allocation3 + $0x1], 1 }
 0x2b6   :  { %859 = vsyncpa [#allocation6], 1 }
 0x2b7   :  { %861 = vsyncpa [#allocation6 + $0x1], 1 }
 0x2b8   :  { %862 = vsyncpa [#allocation9], 1 }
 0x2b9   :  { %863 = vsyncpa [#allocation4], 1 }
 0x2ba   :  { %865 = vsyncpa [#allocation4 + $0x1], 1 }

</bundles_post_ra>
